<compile_context>
chip_gen: v7x
topology: tpu7x:2x2x1
jax: 0.10.0
libtpu: 0.0.40
codegen_flags: <defaults>
</compile_context>

<pallas_src>
import functools

import jax
import jax.numpy as jnp
from jax import lax
from jax.experimental import pallas as pl
from jax.experimental.pallas import tpu as pltpu


_LANE = 128
_SUBLANE = 8
_VMEM_TILE_BUDGET = 20 * 1024 * 1024   # target working set per grid step
_VMEM_LIMIT_BYTES = 40 * 1024 * 1024   # explicit scoped-VMEM request (safe on v5e/v6e/v7x)


def _round_up(x, m):
    return (x + m - 1) // m * m


# ----------------------------------------------------------------------------
# Small-C path: transposed, lane-dense layout (samples on the lane axis).
# ----------------------------------------------------------------------------
def _ce_kernel_small_c(tgt_ref, logits_ref, out_ref, *, n_valid, tile_n):
    """logits_ref: (C, TILE_N) native dtype; tgt_ref: (1, TILE_N) int32."""
    i = pl.program_id(0)
    logits = logits_ref[...]                              # (C, TN)
    c, tn = logits.shape

    # validity mask for the ragged last tile (no wrapper-side padding)
    col = lax.broadcasted_iota(jnp.int32, (1, tn), 1) + i * tile_n
    valid = col < n_valid                                  # (1, TN)

    tgt = tgt_ref[...]                                     # (1, TN) int32

    # fused stable log-sum-exp + target pick: one shifted pass
    lf = logits.astype(jnp.float32)                        # cast folds into the sub
    m = jnp.max(lf, axis=0, keepdims=True)                 # (1, TN)
    s = lf - m                                             # (C, TN)
    sum_e = jnp.sum(jnp.exp(s), axis=0, keepdims=True)     # (1, TN)
    row = lax.broadcasted_iota(jnp.int32, (c, tn), 0)      # class index per sublane
    picked_s = jnp.sum(jnp.where(row == tgt, s, 0.0), axis=0, keepdims=True)
    loss = jnp.log(sum_e) - picked_s                       # (1, TN)

    out_ref[0, 0] = jnp.sum(jnp.where(valid, loss, 0.0))


def _tile_rows_small_c(n, c, itemsize):
    # per-lane-column bytes: double-buffered native input + f32 temporaries
    c_sub = max(c, _SUBLANE)
    per_col = 2 * c_sub * itemsize + 3 * c_sub * 4 + 8 * 4
    tile = _VMEM_TILE_BUDGET // per_col
    tile = max(_LANE, (tile // _LANE) * _LANE)
    tile = min(tile, 8192)                  # amortize ~0.35us/step overhead
    n_lane = _round_up(n, _LANE)
    tile = min(tile, n_lane)
    # keep >= 2 tiles when the batch is big enough so v7x's two TCs both work
    if n_lane >= 2 * _LANE and tile >= n_lane:
        tile = _round_up(pl.cdiv(n, 2), _LANE)
    return tile


def _ce_small_c(preds, targets):
    n, c = preds.shape
    tile_n = _tile_rows_small_c(n, c, preds.dtype.itemsize)
    num_tiles = pl.cdiv(n, tile_n)

    # samples on the lane axis: dense DMAs + full-width vregs for small C
    logits_t = jnp.transpose(preds)          # (C, N)
    targets_row = targets.reshape(1, n)      # lane-dense targets

    kernel = functools.partial(_ce_kernel_small_c, n_valid=n, tile_n=tile_n)
    partials = pl.pallas_call(
        kernel,
        out_shape=jax.ShapeDtypeStruct((num_tiles, 1), jnp.float32),
        grid=(num_tiles,),
        in_specs=[
            pl.BlockSpec((1, tile_n), lambda i: (0, i)),   # targets (int32)
            pl.BlockSpec((c, tile_n), lambda i: (0, i)),   # logits, native dtype
        ],
        out_specs=pl.BlockSpec((1, 1), lambda i: (i, 0),
                               memory_space=pltpu.MemorySpace.SMEM),
        compiler_params=pltpu.CompilerParams(
            dimension_semantics=("parallel",),
            vmem_limit_bytes=_VMEM_LIMIT_BYTES,
        ),
    )(targets_row, logits_t)
    return jnp.sum(partials)


# ----------------------------------------------------------------------------
# Wide-C path: row-major layout, class-axis grid with online LSE.
# ----------------------------------------------------------------------------
def _ce_kernel_large_c(tgt_ref, logits_ref, out_ref, m_sc, l_sc, p_sc, *,
                       n_valid, c_valid, tile_n, tile_c):
    """logits_ref: (TILE_N, TILE_C) native dtype; tgt_ref: (TILE_N, 1) int32."""
    i = pl.program_id(0)          # row tile (parallel)
    j = pl.program_id(1)          # class tile (reduction)
    nj = pl.num_programs(1)

    @pl.when(j == 0)
    def _():
        m_sc[...] = jnp.full_like(m_sc, -jnp.inf)
        l_sc[...] = jnp.zeros_like(l_sc)
        p_sc[...] = jnp.zeros_like(p_sc)

    logits = logits_ref[...].astype(jnp.float32)           # (TN, TC)
    tn, tc = logits.shape
    tgt = tgt_ref[...]                                     # (TN, 1) int32

    # mask classes past C (ragged last class tile) so they never affect the LSE
    col = lax.broadcasted_iota(jnp.int32, (tn, tc), 1) + j * tile_c
    logits = jnp.where(col < c_valid, logits, -jnp.inf)

    # online log-sum-exp
    m_tile = jnp.max(logits, axis=-1, keepdims=True)       # (TN, 1)
    m_new = jnp.maximum(m_sc[...], m_tile)
    alpha = jnp.exp(m_sc[...] - m_new)
    l_sc[...] = l_sc[...] * alpha + jnp.sum(jnp.exp(logits - m_new),
                                            axis=-1, keepdims=True)
    m_sc[...] = m_new

    # target pick (only the tile containing the target class contributes)
    p_sc[...] = p_sc[...] + jnp.sum(jnp.where(col == tgt, logits, 0.0),
                                    axis=-1, keepdims=True)

    @pl.when(j == nj - 1)
    def _():
        row = lax.broadcasted_iota(jnp.int32, (tn, 1), 0) + i * tile_n
        valid = row < n_valid
        loss = m_sc[...] + jnp.log(l_sc[...]) - p_sc[...]
        out_ref[0, 0] = jnp.sum(jnp.where(valid, loss, 0.0))


def _tiles_large_c(n, c, itemsize):
    tile_c = c if c <= 4096 else 2048                     # lane-multiple (or full C)
    per_row = 2 * tile_c * itemsize + 3 * tile_c * 4 + 3 * _LANE * 4
    tile_n = _VMEM_TILE_BUDGET // per_row
    tile_n = max(_SUBLANE, (tile_n // _SUBLANE) * _SUBLANE)
    tile_n = min(tile_n, 1024, _round_up(n, _SUBLANE))
    return tile_n, tile_c


def _ce_large_c(preds, targets):
    n, c = preds.shape
    tile_n, tile_c = _tiles_large_c(n, c, preds.dtype.itemsize)
    grid = (pl.cdiv(n, tile_n), pl.cdiv(c, tile_c))

    targets_col = targets.reshape(n, 1)

    kernel = functools.partial(_ce_kernel_large_c, n_valid=n, c_valid=c,
                               tile_n=tile_n, tile_c=tile_c)
    partials = pl.pallas_call(
        kernel,
        out_shape=jax.ShapeDtypeStruct((grid[0], 1), jnp.float32),
        grid=grid,
        in_specs=[
            pl.BlockSpec((tile_n, 1), lambda i, j: (i, 0)),       # targets
            pl.BlockSpec((tile_n, tile_c), lambda i, j: (i, j)),  # logits
        ],
        out_specs=pl.BlockSpec((1, 1), lambda i, j: (i, 0),
                               memory_space=pltpu.MemorySpace.SMEM),
        scratch_shapes=[pltpu.VMEM((tile_n, 1), jnp.float32)] * 3,  # m, l, picked
        compiler_params=pltpu.CompilerParams(
            dimension_semantics=("parallel", "arbitrary"),
            vmem_limit_bytes=_VMEM_LIMIT_BYTES,
        ),
    )(targets_col, preds)
    return jnp.sum(partials)


# ----------------------------------------------------------------------------
# Public entry point (matches physioex CrossEntropyLoss.forward)
# ----------------------------------------------------------------------------
def cross_entropy_loss(emb, preds, targets):
    """Pallas equivalent of physioex CrossEntropyLoss.forward (emb is ignored)."""
    del emb  # unused, same as the PyTorch module
    n, c = preds.shape
    targets = targets.astype(jnp.int32)
    if c < _LANE:
        total = _ce_small_c(preds, targets)      # lane-dense transposed layout
    else:
        total = _ce_large_c(preds, targets)      # row-major, class-axis grid
    # mean reduction over the true batch size (PyTorch default)
    return total / jnp.float32(n)


def _reference(preds, targets):
    """Plain-JAX reference (== torch.nn.CrossEntropyLoss default)."""
    logp = jax.nn.log_softmax(preds.astype(jnp.float32), axis=-1)
    picked = jnp.take_along_axis(logp, targets[:, None].astype(jnp.int32), axis=-1)
    return -jnp.mean(picked)


if __name__ == "__main__":
    key = jax.random.PRNGKey(0)
    k_emb, k_preds, k_tgt = jax.random.split(key, 3)

    # sleep-staging-like shapes: small batch, 5 classes, embedding unused
    N, C, H = 16, 5, 32
    emb = jax.random.normal(k_emb, (N, H), dtype=jnp.float32)       # unused
    preds = jax.random.normal(k_preds, (N, C), dtype=jnp.float32)   # logits
    targets = jax.random.randint(k_tgt, (N,), 0, C, dtype=jnp.int32)

    loss = jax.block_until_ready(cross_entropy_loss(emb, preds, targets))
    ref = _reference(preds, targets)
    assert jnp.allclose(loss, ref, atol=1e-5, rtol=1e-5), (loss, ref)

    # ragged batch (N not a lane multiple) through the small-C masked path
    N2 = 13
    preds2 = jax.random.normal(jax.random.PRNGKey(1), (N2, C), dtype=jnp.float32)
    targets2 = jax.random.randint(jax.random.PRNGKey(2), (N2,), 0, C, dtype=jnp.int32)
    emb2 = jnp.zeros((N2, H), dtype=jnp.float32)
    loss2 = jax.block_until_ready(cross_entropy_loss(emb2, preds2, targets2))
    ref2 = _reference(preds2, targets2)
    assert jnp.allclose(loss2, ref2, atol=1e-5, rtol=1e-5), (loss2, ref2)

    # bf16 logits: native-dtype DMA, f32 math in-kernel
    preds3 = jax.random.normal(jax.random.PRNGKey(3), (N, C), dtype=jnp.bfloat16)
    loss3 = jax.block_until_ready(cross_entropy_loss(emb, preds3, targets))
    ref3 = _reference(preds3, targets)
    assert jnp.allclose(loss3, ref3, atol=1e-4, rtol=1e-4), (loss3, ref3)

    # wide-class path: class-axis grid + online LSE with a ragged class tail
    N4, C4 = 24, 4352
    preds4 = jax.random.normal(jax.random.PRNGKey(4), (N4, C4), dtype=jnp.float32)
    targets4 = jax.random.randint(jax.random.PRNGKey(5), (N4,), 0, C4, dtype=jnp.int32)
    emb4 = jnp.zeros((N4, H), dtype=jnp.float32)
    loss4 = jax.block_until_ready(cross_entropy_loss(emb4, preds4, targets4))
    ref4 = _reference(preds4, targets4)
    assert jnp.allclose(loss4, ref4, atol=1e-4, rtol=1e-4), (loss4, ref4)

    print("KERNEL_OK")
</pallas_src>

<mosaic_0001>
module attributes {stable_mosaic.version = 11 : i64} {
  func.func @_ce_kernel_small_c(%arg0: i32, %arg1: memref<1x128xi32, #tpu.memory_space<vmem>>, %arg2: memref<5x128xf32, #tpu.memory_space<vmem>>, %arg3: memref<1x1xf32, #tpu.memory_space<smem>>) attributes {dimension_semantics = [#tpu.dimension_semantics<parallel>], iteration_bounds = array<i64: 1>, scalar_prefetch = 0 : i64, scratch_operands = 0 : i64, tpu.core_type = #tpu.core_type<tc>, window_params = [{transform_indices = @transform_0, window_bounds = array<i64: 1, 128>}, {transform_indices = @transform_1, window_bounds = array<i64: 5, 128>}, {transform_indices = @transform_2, window_bounds = array<i64: 1, 1>}]} {
    %c0 = arith.constant 0 : index
    %c0_0 = arith.constant 0 : index
    %0 = vector.load %arg2[%c0, %c0_0] : memref<5x128xf32, #tpu.memory_space<vmem>>, vector<5x128xf32>
    %1 = tpu.iota {dimensions = array<i32: 1>} : vector<1x128xi32>
    %c128_i32 = arith.constant 128 : i32
    %2 = arith.muli %arg0, %c128_i32 : i32
    %3 = vector.broadcast %2 : i32 to vector<1x128xi32>
    %4 = arith.addi %1, %3 : vector<1x128xi32>
    %c16_i32 = arith.constant 16 : i32
    %5 = vector.broadcast %c16_i32 : i32 to vector<1x128xi32>
    %6 = arith.cmpi slt, %4, %5 : vector<1x128xi32>
    %c0_1 = arith.constant 0 : index
    %c0_2 = arith.constant 0 : index
    %7 = vector.load %arg1[%c0_1, %c0_2] : memref<1x128xi32, #tpu.memory_space<vmem>>, vector<1x128xi32>
    %cst = arith.constant dense<0xFF800000> : vector<128xf32>
    %8 = vector.multi_reduction <maximumf>, %0, %cst [0] : vector<5x128xf32> to vector<128xf32>
    %9 = vector.shape_cast %8 : vector<128xf32> to vector<1x128xf32>
    %10 = vector.broadcast %9 : vector<1x128xf32> to vector<5x128xf32>
    %11 = arith.subf %0, %10 : vector<5x128xf32>
    %12 = math.exp %11 : vector<5x128xf32>
    %cst_3 = arith.constant dense<0.000000e+00> : vector<128xf32>
    %13 = vector.multi_reduction <add>, %12, %cst_3 [0] : vector<5x128xf32> to vector<128xf32>
    %14 = vector.shape_cast %13 : vector<128xf32> to vector<1x128xf32>
    %15 = tpu.iota {dimensions = array<i32: 0>} : vector<5x128xi32>
    %16 = vector.broadcast %7 : vector<1x128xi32> to vector<5x128xi32>
    %17 = arith.cmpi eq, %15, %16 : vector<5x128xi32>
    %cst_4 = arith.constant 0.000000e+00 : f32
    %18 = vector.broadcast %cst_4 : f32 to vector<5x128xf32>
    %19 = arith.select %17, %11, %18 : vector<5x128xi1>, vector<5x128xf32>
    %cst_5 = arith.constant dense<0.000000e+00> : vector<128xf32>
    %20 = vector.multi_reduction <add>, %19, %cst_5 [0] : vector<5x128xf32> to vector<128xf32>
    %21 = vector.shape_cast %20 : vector<128xf32> to vector<1x128xf32>
    %22 = math.log %14 : vector<1x128xf32>
    %23 = arith.subf %22, %21 : vector<1x128xf32>
    %cst_6 = arith.constant 0.000000e+00 : f32
    %24 = vector.broadcast %cst_6 : f32 to vector<1x128xf32>
    %25 = arith.select %6, %23, %24 : vector<1x128xi1>, vector<1x128xf32>
    %26 = vector.shape_cast %25 : vector<1x128xf32> to vector<1x1x128xf32>
    %cst_7 = arith.constant dense<0.000000e+00> : vector<1xf32>
    %27 = vector.multi_reduction <add>, %26, %cst_7 [1, 2] : vector<1x1x128xf32> to vector<1xf32>
    %28 = vector.shape_cast %27 : vector<1xf32> to vector<1x1x1xf32>
    %29 = vector.extract %28[0, 0, 0] : f32 from vector<1x1x1xf32>
    %c0_8 = arith.constant 0 : index
    %c0_9 = arith.constant 0 : index
    %30 = memref.load %arg3[%c0_8, %c0_9] : memref<1x1xf32, #tpu.memory_space<smem>>
    memref.store %29, %arg3[%c0_8, %c0_9] : memref<1x1xf32, #tpu.memory_space<smem>>
    return
  }
  func.func @transform_0(%arg0: i32) -> (i32, i32) {
    %c0_i32 = arith.constant 0 : i32
    %c0_i32_0 = arith.constant 0 : i32
    return %c0_i32, %arg0 : i32, i32
  }
  func.func @transform_1(%arg0: i32) -> (i32, i32) {
    %c0_i32 = arith.constant 0 : i32
    %c0_i32_0 = arith.constant 0 : i32
    return %c0_i32, %arg0 : i32, i32
  }
  func.func @transform_2(%arg0: i32) -> (i32, i32) {
    %c0_i32 = arith.constant 0 : i32
    %c0_i32_0 = arith.constant 0 : i32
    return %arg0, %c0_i32 : i32, i32
  }
}

</mosaic_0001>

<bundles_post_ra>
// kernel: tpu_custom_call.1
= control target key start
LH: loop header
LB: loop body
LE: loop exit
PB: predicated region body
PF: predicated region fallthrough
CT: control target
= control target key end

     0   :  { %7 = vsyncpa [#allocation3], 0  ;;  %s236_s0 = inlined_call_operand.hbm [shape: s32[1,16], index: 0, kind: input, shape index: {}]   ;;  %s237_s1 = inlined_call_operand.hbm [shape: f32[5,16], index: 1, kind: input, shape index: {}]   ;;  %s238_s2 = inlined_call_operand.hbm [shape: f32[1,1], index: 2, kind: output, shape index: {}]  }
   0x1   :  { %8 = vsyncpa [#allocation6], 0 }
   0x2   :  { %9 = vsyncpa [#allocation4], 0  ;;  %s179_s9 = smov [#allocation2]   ;;  %s180_s11 = smov [#allocation5]  }
   0x3   :  { %s16_s10 = sshll.u32 %s179_s9, 4  ;;  %s26_s12 = sshll.u32 %s180_s11, 4  ;;  %s17_s10 = int_to_ptr.vmem [resolvable:$true] %s16_s10  ;;  %s27_s12 = int_to_ptr.vmem [resolvable:$true] %s26_s12 }
   0x4   :  { %s119_s15 = scalar_lea.hbm %s236_s0, 16 }
   0x5   :  { %p120_p0 = scmp.ne.s32.totalorder %s236_s0, %s119_s15  ;;  %p123_p1 = scmp.lt.u32.totalorder %s119_s15, %s236_s0 }
   0x7   :  { %p125_p2 = pnand %p123_p1, %p120_p0 }
   0x9   :  { %128 = shalt.err (!%p125_p2)
}
   0xa   :  { %s129_s20 = scalar_lea.vmem %s17_s10, 16  ;;  %s133_s21 = scalar_lea.vmem %s17_s10, 32 }
   0xb   :  { %p130_p3 = scmp.ne.s32.totalorder %s17_s10, %s129_s20  ;;  %p134_p4 = scmp.lt.s32.totalorder %s17_s10, %s17_s10 }
   0xc   :  { %p135_p5 = scmp.lt.s32.totalorder %s133_s21, %s129_s20 }
   0xe   :  { %p136_p6 = por %p135_p5, %p134_p4 }
  0x10   :  { %p137_p7 = pnand %p136_p6, %p130_p3 }
  0x12   :  { %140 = shalt.err (!%p137_p7)
}
  0x13   :  { %19 = dma.hbm_to_vmem [thread:$0]  %s236_s0, 16, %s17_s10, [#allocation3]  }
  0x14   :  { %s141_s26 = scalar_lea.hbm %s237_s1, 128 }
  0x15   :  { %p142_p8 = scmp.ne.s32.totalorder %s237_s1, %s141_s26  ;;  %p145_p9 = scmp.lt.u32.totalorder %s141_s26, %s237_s1 }
  0x17   :  { %p147_p10 = pnand %p145_p9, %p142_p8 }
  0x19   :  { %150 = shalt.err (!%p147_p10)
}
  0x1a   :  { %s151_s3 = scalar_lea.vmem %s27_s12, 128  ;;  %p156_p12 = scmp.lt.s32.totalorder %s27_s12, %s27_s12 }
  0x1b   :  { %p152_p11 = scmp.ne.s32.totalorder %s27_s12, %s151_s3  ;;  %p157_p13 = scmp.lt.s32.totalorder %s151_s3, %s151_s3 }
  0x1d   :  { %p158_p0 = por %p157_p13, %p156_p12 }
  0x1f   :  { %p159_p1 = pnand %p158_p0, %p152_p11 }
  0x21   :  { %162 = shalt.err (!%p159_p1)
}
  0x22   :  { %29 = dma.hbm_to_vmem [thread:$0]  %s237_s1, 128, %s27_s12, [#allocation6]  }
  0x23   :  { %173 = dma.done.wait [#allocation3], 16  }
  0x24   :  { %174 = vsyncadd [#allocation3], 4294967280 }
  0x25   :  { %175 = dma.done.wait [#allocation6], 128  }
  0x26   :  { %176 = vsyncadd [#allocation6], 4294967168  ;;  %vm44_vm0 = vcmask 1044480   ;;  %v36_v0 = vld [vmem:[#allocation5] sm:$0x1f]  ;;  %v37_v8 = vlaneseq  ;;  %vm81_vm3 = vcmask 1040384  }
  0x27   :  { %v45_v1 = vsel %vm44_vm0, %v36_v0, -inf  ;;  %v109_v12 = vld [vmem:[#allocation2] ss:$0 sm:$0xff]  ;;  %s163_s7 = scalar_lea.hbm %s238_s2, 16 }
  0x28   :  { %v46_v2 = vrot.slane %v45_v1, 4  ;;  %v63_v11 = vshrl.u32 %v37_v8, 7  ;;  %v38_v28 = vand.u32 127, %v37_v8  ;;  %p164_p2 = scmp.ne.s32.totalorder %s238_s2, %s163_s7  ;;  %p167_p3 = scmp.lt.u32.totalorder %s163_s7, %s238_s2 }
  0x2a   :  { %v47_v3 = vmax.f32 %v45_v1, %v46_v2  ;;  %vm68_vm1 = vcmp.eq.s32.totalorder %v63_v11, %v109_v12  ;;  %vm42_vm2 = vcmp.lt.s32.totalorder %v38_v28, 16  ;;  %p169_p4 = pnand %p167_p3, %p164_p2 }
  0x2c   :  { %v48_v4 = vrot.slane %v47_v3, 2 }
  0x2e   :  { %v49_v5 = vmax.f32 %v47_v3, %v48_v4 }
  0x30   :  { %v50_v6 = vrot.slane %v49_v5, 1 }
  0x32   :  { %v51_v7 = vmax.f32 %v49_v5, %v50_v6 }
  0x34   :  { %v52_v9 = vsub.f32 %v36_v0, %v51_v7 }
  0x36   :  { %v53_v10 = vmul.f32 1.442695, %v52_v9  ;;  %v69_v13 = vsel %vm68_vm1, %v52_v9, 0.0 }
  0x37   :  { %v70_v15 = vsel %vm44_vm0, %v69_v13, 0.0 }
  0x38   :  { %115 = vpow2.f32 %v53_v10  ;;  %v71_v18 = vrot.slane %v70_v15, 4 }
  0x3a   :  { %v72_v21 = vadd.f32 %v71_v18, %v70_v15 }
  0x3c   :  { %v73_v24 = vrot.slane %v72_v21, 2 }
  0x3e   :  { %v74_v26 = vadd.f32 %v73_v24, %v72_v21 }
  0x40   :  { %v75_v27 = vrot.slane %v74_v26, 1 }
  0x42   :  { %v116_v14 = vpop.eup %115  ;;  %v76_v29 = vadd.f32 %v75_v27, %v74_v26 }
  0x43   :  { %v55_v16 = vsel %vm44_vm0, %v116_v14, 0.0 }
  0x44   :  { %v56_v17 = vrot.slane %v55_v16, 4 }
  0x46   :  { %v57_v19 = vadd.f32 %v56_v17, %v55_v16 }
  0x48   :  { %v58_v20 = vrot.slane %v57_v19, 2 }
  0x4a   :  { %v59_v22 = vadd.f32 %v58_v20, %v57_v19 }
  0x4c   :  { %v60_v23 = vrot.slane %v59_v22, 1 }
  0x4e   :  { %v61_v25 = vadd.f32 %v60_v23, %v59_v22 }
  0x50   :  { %117 = vlog2.f32 %v61_v25 }
  0x5a   :  { %v118_v30 = vpop.eup %117 }
  0x5b   :  { %v78_v31 = vmul.f32 0.6931472, %v118_v30 }
  0x5d   :  { %v79_v32 = vsub.f32 %v78_v31, %v76_v29 }
  0x5f   :  { %v80_v33 = vsel %vm42_vm2, %v79_v32, 0.0 }
  0x60   :  { %v82_v34 = vsel %vm81_vm3, %v80_v33, 0.0 }
  0x61   :  { %83 = vadd.xlane.f32.xlu0 %v82_v34 }
  0xee   :  { %v84_v35 = vpop.xlane.xlu0 %83 }
  0xef   :  { %v85_v36 = vrot.slane %v84_v35, 4 }
  0xf1   :  { %v86_v37 = vadd.f32 %v85_v36, %v84_v35 }
  0xf3   :  { %v87_v38 = vrot.slane %v86_v37, 2 }
  0xf5   :  { %v88_v39 = vadd.f32 %v87_v38, %v86_v37 }
  0xf7   :  { %v89_v40 = vrot.slane %v88_v39, 1 }
  0xf9   :  { %v90_v41 = vadd.f32 %v89_v40, %v88_v39 }
  0xfb   :  { %110 = vpush %v90_v41 }
 0x12c   :  { %s111_s1 = spop %110 }
 0x12d   :  { %93 = sst [smem:[#allocation7]] %s111_s1 }
 0x12e   :  { %172 = shalt.err (!%p169_p4)
}
 0x12f   :  { %s181_s12 = smov [#allocation7]  }
 0x130   :  { %101 = dma.smem_to_hbm %s181_s12, 16, %s238_s2, [#allocation4]  }
 0x131   :  { %177 = dma.done.wait [#allocation4], 16  }
 0x132   :  { %178 = vsyncadd [#allocation4], 4294967280 }
 0x133   :  { %105 = sfence }
 0x134   :  { %106 = vsyncpa [#allocation3], 1 }
 0x135   :  { %107 = vsyncpa [#allocation6], 1 }
 0x136   :  { %108 = vsyncpa [#allocation4], 1 }

</bundles_post_ra>
